<compile_context>
chip_gen: v5e
topology: v5e:2x2
jax: 0.10.0
libtpu: 0.0.40
codegen_flags: <defaults>
</compile_context>

<pallas_src>
import functools
import math

import jax
import jax.numpy as jnp
from jax.experimental import pallas as pl
from jax.experimental.pallas import tpu as pltpu

_MIB = 1024 * 1024


def _pe_add_kernel(x_ref, pe_ref, o_ref, *, batch: int, d_model: int):
    # x_ref / o_ref: (ts, batch * d_model) flattened blocks; pe_ref: (ts, d_model).
    pe = pe_ref[...]
    if batch == 1:
        o_ref[...] = x_ref[...] + pe
    else:
        # Static slices are free ref views: no replicated pe temporary, no lane concat.
        # When d_model % 128 == 0 every slice is lane-tile aligned (unmasked stores);
        # otherwise the masked partial stores are unavoidable without padding x.
        # (Unrolls `batch` times at trace time — fine for typical transformer batches.)
        for b in range(batch):
            sl = slice(b * d_model, (b + 1) * d_model)
            o_ref[:, sl] = x_ref[:, sl] + pe


def make_positional_encoding(d_model: int, max_len: int = 5000,
                             dtype=jnp.float32) -> jnp.ndarray:
    """Build the (max_len, d_model) sinusoidal table, identical to the torch init."""
    position = jnp.arange(0, max_len, dtype=jnp.float32)[:, None]            # (max_len, 1)
    div_term = jnp.exp(
        jnp.arange(0, d_model, 2, dtype=jnp.float32) * (-math.log(10000.0) / d_model)
    )                                                                         # (ceil(d/2),)
    pe = jnp.zeros((max_len, d_model), dtype=jnp.float32)
    pe = pe.at[:, 0::2].set(jnp.sin(position * div_term))
    # Slice the cos half so odd d_model does not shape-mismatch (torch edge case).
    pe = pe.at[:, 1::2].set(jnp.cos(position * div_term)[:, : d_model // 2])
    return pe.astype(dtype)


def _vmem_capacity_bytes() -> int:
    """Physical VMEM per TensorCore; conservative 64 MiB (v7x) if the query fails."""
    try:
        info = pltpu.get_tpu_info()
        cap = getattr(info, "vmem_capacity_bytes", None)
        if cap:
            return int(cap)
    except Exception:
        pass
    return 64 * _MIB


def positional_encoding_forward(x: jnp.ndarray, pe: jnp.ndarray, *,
                                ts: int | None = None,
                                vmem_budget_bytes: int | None = None) -> jnp.ndarray:
    """x: (S, B, D); pe: (max_len, D) with max_len >= S.  Returns x + pe[:S] broadcast over B."""
    S, B, D = x.shape
    if pe.shape[0] < S or pe.shape[1] != D:
        raise ValueError(f"pe table {pe.shape} incompatible with input {x.shape}")

    pe_s = pe[:S].astype(x.dtype)      # (S, D): slice so full-extent blocks are always legal
    x2 = x.reshape(S, B * D)           # free contiguous view: lane axis = B*D

    itemsize = int(x.dtype.itemsize)
    packing = max(8, 32 // itemsize)   # sublane rows per packed tile: 8 f32 / 16 bf16 / 32 i8

    cap = _vmem_capacity_bytes()
    if vmem_budget_bytes is None:
        # 3/8 of physical VMEM: 48 MiB on v5e/v6e (128 MiB), 24 MiB on v7x (64 MiB).
        vmem_budget_bytes = max(8 * _MIB, (cap * 3) // 8)
    if ts is None:
        ts = 2048 if cap >= 128 * _MIB else 512

    # Per-row bytes of one grid step: double-buffered x-in + out blocks (width bt*D)
    # plus the double-buffered pe block (width D).
    def _bytes_per_row(bt: int) -> int:
        return 2 * itemsize * D * (2 * bt + 1)

    # --- batch tile: full batch unless the VMEM budget forces lane-dim tiling ---
    max_bt = int((vmem_budget_bytes // (packing * 2 * itemsize * D) - 1) // 2)
    if max_bt < 1:
        raise ValueError(
            f"d_model={D} too large: even a ({packing}, {D}) single-batch tile exceeds "
            f"the VMEM budget of {vmem_budget_bytes} bytes")
    if max_bt >= B:
        bt = B                                   # full lane extent -> no 128-alignment needed
    else:
        # Partial-width lane blocks must be 128-lane aligned: bt*D % 128 == 0.
        m = 128 // math.gcd(D, 128)
        bt = (max_bt // m) * m
        if bt < 1:
            raise ValueError(
                f"cannot tile the batch dim to a 128-lane-aligned width within the VMEM "
                f"budget (need a multiple of {m}, budget allows at most {max_bt})")

    # --- seq tile: as large as the budget allows, >= 2 grid steps for v7x megacore ---
    bytes_per_row = _bytes_per_row(bt)
    ts_cap = max(packing, (vmem_budget_bytes // bytes_per_row) // packing * packing)
    ts_eff = min(ts, ts_cap, S)
    half = -(-S // 2)                            # cdiv(S, 2)
    half_up = -(-half // packing) * packing      # rounded up to the sublane packing
    if half_up < S:
        ts_eff = min(ts_eff, half_up)            # guarantees >= 2 parallel seq steps
    if ts_eff >= S:
        ts_eff = S                               # full-extent block: no divisibility constraint
    else:
        ts_eff = max(packing, (ts_eff // packing) * packing)

    grid = (pl.cdiv(S, ts_eff), pl.cdiv(B, bt))  # ragged tails handled (OOB writes dropped)

    # Scoped VMEM limit tied to the real footprint (+margin), never above half physical.
    footprint = ts_eff * bytes_per_row
    vmem_limit = int(min(cap // 2, max(footprint + 8 * _MIB, 32 * _MIB)))

    out2 = pl.pallas_call(
        functools.partial(_pe_add_kernel, batch=bt, d_model=D),
        out_shape=jax.ShapeDtypeStruct((S, B * D), x.dtype),
        grid_spec=pltpu.PrefetchScalarGridSpec(
            num_scalar_prefetch=0,
            grid=grid,
            in_specs=[
                pl.BlockSpec((ts_eff, bt * D), lambda i, j: (i, j)),   # x tile (lane-dense)
                pl.BlockSpec((ts_eff, D), lambda i, j: (i, 0)),        # pe rows (shared over j)
            ],
            out_specs=pl.BlockSpec((ts_eff, bt * D), lambda i, j: (i, j)),
        ),
        compiler_params=pltpu.CompilerParams(
            dimension_semantics=("parallel", "parallel"),   # megacore-shardable on v7x
            vmem_limit_bytes=vmem_limit,
        ),
    )(x2, pe_s)
    return out2.reshape(S, B, D)


if __name__ == "__main__":
    key = jax.random.PRNGKey(0)
    k1, k2 = jax.random.split(key)

    # Small shapes consistent with the module's seq-first forward: (seq, batch, d_model)
    S, B, D = 8, 2, 32
    MAX_LEN = 5000

    pe = make_positional_encoding(D, MAX_LEN)            # deterministic "parameter" buffer
    x = jax.random.normal(k1, (S, B, D), dtype=jnp.float32)

    out = jax.block_until_ready(positional_encoding_forward(x, pe))
    ref = x + pe[:S][:, None, :]                          # eval-mode dropout = identity
    assert out.shape == (S, B, D)
    assert jnp.allclose(out, ref, atol=1e-6), "mismatch vs reference"

    # Second check: multi-block seq grid with a ragged tail (S not a multiple of ts).
    S2 = 24
    x_b = jax.random.normal(k2, (S2, B, D), dtype=jnp.float32)
    out_b = jax.block_until_ready(positional_encoding_forward(x_b, pe, ts=16))
    ref_b = x_b + pe[:S2][:, None, :]
    assert jnp.allclose(out_b, ref_b, atol=1e-6), "mismatch vs reference (ragged tail)"

    print("KERNEL_OK")
</pallas_src>

<mosaic_0001>
module attributes {stable_mosaic.version = 11 : i64} {
  func.func @_pe_add_kernel(%arg0: i32, %arg1: i32, %arg2: memref<8x64xf32, #tpu.memory_space<vmem>>, %arg3: memref<8x32xf32, #tpu.memory_space<vmem>>, %arg4: memref<8x64xf32, #tpu.memory_space<vmem>>) attributes {dimension_semantics = [#tpu.dimension_semantics<parallel>, #tpu.dimension_semantics<parallel>], iteration_bounds = array<i64: 1, 1>, scalar_prefetch = 0 : i64, scratch_operands = 0 : i64, tpu.core_type = #tpu.core_type<tc>, window_params = [{transform_indices = @transform_0, window_bounds = array<i64: 8, 64>}, {transform_indices = @transform_1, window_bounds = array<i64: 8, 32>}, {transform_indices = @transform_2, window_bounds = array<i64: 8, 64>}]} {
    %c0 = arith.constant 0 : index
    %c0_0 = arith.constant 0 : index
    %0 = vector.load %arg3[%c0, %c0_0] : memref<8x32xf32, #tpu.memory_space<vmem>>, vector<8x32xf32>
    %c0_1 = arith.constant 0 : index
    %c0_2 = arith.constant 0 : index
    %1 = vector.load %arg2[%c0_1, %c0_2] : memref<8x64xf32, #tpu.memory_space<vmem>>, vector<8x32xf32>
    %2 = arith.addf %1, %0 : vector<8x32xf32>
    %c0_3 = arith.constant 0 : index
    %c0_4 = arith.constant 0 : index
    %3 = vector.load %arg4[%c0_3, %c0_4] : memref<8x64xf32, #tpu.memory_space<vmem>>, vector<8x32xf32>
    tpu.vector_store %arg4[%c0_3, %c0_4], %2 {strides = array<i32>} : memref<8x64xf32, #tpu.memory_space<vmem>>, vector<8x32xf32>,
    %c0_5 = arith.constant 0 : index
    %c32 = arith.constant 32 : index
    %4 = vector.load %arg2[%c0_5, %c32] : memref<8x64xf32, #tpu.memory_space<vmem>>, vector<8x32xf32>
    %5 = arith.addf %4, %0 : vector<8x32xf32>
    %c0_6 = arith.constant 0 : index
    %c32_7 = arith.constant 32 : index
    %6 = vector.load %arg4[%c0_6, %c32_7] : memref<8x64xf32, #tpu.memory_space<vmem>>, vector<8x32xf32>
    tpu.vector_store %arg4[%c0_6, %c32_7], %5 {strides = array<i32>} : memref<8x64xf32, #tpu.memory_space<vmem>>, vector<8x32xf32>,
    return
  }
  func.func @transform_0(%arg0: i32, %arg1: i32) -> (i32, i32) {
    %c0_i32 = arith.constant 0 : i32
    return %arg0, %arg1 : i32, i32
  }
  func.func @transform_1(%arg0: i32, %arg1: i32) -> (i32, i32) {
    %c0_i32 = arith.constant 0 : i32
    %c0_i32_0 = arith.constant 0 : i32
    return %arg0, %c0_i32 : i32, i32
  }
  func.func @transform_2(%arg0: i32, %arg1: i32) -> (i32, i32) {
    %c0_i32 = arith.constant 0 : i32
    return %arg0, %arg1 : i32, i32
  }
}

</mosaic_0001>

<bundles_post_ra>
// kernel: tpu_custom_call.1
= control target key start
LH: loop header
LB: loop body
LE: loop exit
PB: predicated region body
PF: predicated region fallthrough
CT: control target
= control target key end

     0   :  { %7 = vsyncpa [#allocation3], 0  ;;  %s181_s0 = inlined_call_operand.hbm [shape: f32[8,64], index: 0, kind: input, shape index: {}]   ;;  %s182_s1 = inlined_call_operand.hbm [shape: f32[8,32], index: 1, kind: input, shape index: {}]   ;;  %s183_s2 = inlined_call_operand.hbm [shape: f32[8,64], index: 2, kind: output, shape index: {}]  }
   0x1   :  { %8 = vsyncpa [#allocation6], 0 }
   0x2   :  { %9 = vsyncpa [#allocation4], 0  ;;  %s15_s11 = sshll.u32 %s181_s0, 4  ;;  %s153_s12 = smov [#allocation2]   ;;  %s16_s11 = int_to_ptr.hbm [resolvable:$true] %s15_s11 }
   0x3   :  { %s17_s13 = sshll.u32 %s153_s12, 4  ;;  %s26_s16 = sshll.u32 %s182_s1, 4  ;;  %s18_s13 = int_to_ptr.vmem [resolvable:$true] %s17_s13  ;;  %s27_s16 = int_to_ptr.hbm [resolvable:$true] %s26_s16 }
   0x4   :  { %20 = dma.hbm_to_vmem [thread:$0]  %s16_s11, 128, %s18_s13, [#allocation3]  }
   0x5   :  { %s154_s17 = smov [#allocation5]  }
   0x6   :  { %s28_s18 = sshll.u32 %s154_s17, 4  ;;  %s29_s18 = int_to_ptr.vmem [resolvable:$true] %s28_s18 }
   0x7   :  { %31 = dma.hbm_to_vmem [thread:$0]  %s27_s16, 128, %s29_s18, [#allocation6]  }
   0x8   :  { %147 = dma.done.wait [#allocation3], 128  }
   0x9   :  { %148 = vsyncadd [#allocation3], 4294967168 }
   0xa   :  { %149 = dma.done.wait [#allocation6], 128  }
   0xb   :  { %150 = vsyncadd [#allocation6], 4294967168  ;;  %v40_v0 = vld [vmem:[#allocation5] sm:$0xff]  ;;  %v41_v1 = vld [vmem:[#allocation2] sm:$0xff]  ;;  %vm43_vm0 = vcmask 261120   ;;  %s155_s0 = smov 32  }
   0xc   :  { %v42_v2 = vadd.f32 %v41_v1, %v40_v0  ;;  %47 = vrot.lane.b32.xlu0 %v40_v0, %s155_s0  ;;  %s156_s19 = smov [#allocation7]   ;;  %s60_s22 = sshll.u32 %s183_s2, 4  ;;  %vm51_vm1 = vcmask 523520   ;;  %s61_s22 = int_to_ptr.hbm [resolvable:$true] %s60_s22 }
   0xd   :  { %s58_s20 = sshll.u32 %s156_s19, 4  ;;  %s59_s20 = int_to_ptr.vmem [resolvable:$true] %s58_s20 }
   0xe   :  { %44 = vst.msk [vmem:[#allocation7] sm:$0xff] %vm43_vm0, %v42_v2 }
  0x7e   :  { %v48_v3 = vpop.permute.xlu0 %47 }
  0x7f   :  { %v50_v4 = vadd.f32 %v48_v3, %v41_v1 }
  0x81   :  { %52 = vst.msk [vmem:[#allocation7] sm:$0xff] %vm51_vm1, %v50_v4 }
  0x82   :  { %63 = dma.vmem_to_hbm [thread:$0]  %s59_s20, 128, %s61_s22, [#allocation4]  }
  0x83   :  { %151 = dma.done.wait [#allocation4], 128  }
  0x84   :  { %152 = vsyncadd [#allocation4], 4294967168 }
  0x85   :  { %68 = vsyncpa [#allocation3], 1 }
  0x86   :  { %69 = vsyncpa [#allocation6], 1 }
  0x87   :  { %70 = vsyncpa [#allocation4], 1 }

</bundles_post_ra>
